<compile_context>
chip_gen: v7x
topology: tpu7x:2x2x1
jax: 0.10.0
libtpu: 0.0.40
codegen_flags: <defaults>
</compile_context>

<pallas_src>
import functools

import jax
import jax.numpy as jnp
from jax.experimental import pallas as pl
from jax.experimental.pallas import tpu as pltpu


D_PAD = 128   # every feature dim padded to one lane-dense vreg width


# ----------------------------- Pallas kernel --------------------------------

def smallfc_fw_kernel(x_ref, w_ref, b_ref, out_ref, *, num_layers, compute_dtype):
    """One batch tile of the whole MLP (statically unrolled over layers).

    x_ref  : (TILE_B, D_PAD)              f32  zero-padded activations tile
    w_ref  : (num_layers*D_PAD, D_PAD)    compute_dtype  packed weights, (in, out)
                                          layout, layer i in rows [i*128, (i+1)*128)
    b_ref  : (round_up(num_layers,8), D_PAD) f32  layer i bias in sublane row i
    out_ref: (TILE_B, D_PAD)              f32  lane-dense output (real cols sliced outside)
    """
    out = x_ref[...]                                   # f32 activations
    for i in range(num_layers):
        w = w_ref[pl.ds(i * D_PAD, D_PAD), :]          # (D_PAD, D_PAD), static slice
        b = b_ref[pl.ds(i, 1), :]                      # (1, D_PAD), f32
        acc = jnp.dot(out.astype(compute_dtype), w,
                      preferred_element_type=jnp.float32) + b
        out = jnp.tanh(acc) if i < num_layers - 1 else acc   # last layer: identity
    out_ref[...] = out.astype(out_ref.dtype)


# ------------------------------- wrapper -------------------------------------

def _round_up(n, m):
    return ((n + m - 1) // m) * m


def _choose_tile_b(B):
    """Small batches -> one grid step; large batches -> 256-row tiles (>=2 steps)."""
    if B <= 256:
        return _round_up(B, 8)
    return 256


def pack_params(params, weight_dtype=jnp.float32):
    """Pack [(W(in,out), b(1,out)), ...] into single lane-dense weight/bias buffers."""
    num_layers = len(params)
    for w, b in params:
        d_in, d_out = w.shape
        assert d_in <= D_PAD and d_out <= D_PAD, (
            f"layer dims ({d_in},{d_out}) exceed the {D_PAD}-lane packing")
    w_packed = jnp.zeros((num_layers * D_PAD, D_PAD), weight_dtype)
    b_packed = jnp.zeros((_round_up(num_layers, 8), D_PAD), jnp.float32)
    for i, (w, b) in enumerate(params):
        d_in, d_out = w.shape
        w_packed = w_packed.at[i * D_PAD:i * D_PAD + d_in, :d_out].set(
            jnp.asarray(w, weight_dtype))
        b_packed = b_packed.at[i, :d_out].set(
            jnp.reshape(jnp.asarray(b, jnp.float32), (-1,)))
    return w_packed, b_packed


@functools.partial(jax.jit, static_argnames=("tile_b", "num_layers", "out_d"))
def _smallfc_fw_jit(x, w_packed, b_packed, *, tile_b, num_layers, out_d):
    """Jitted: zero-pad -> pallas_call -> slice, fused into one dispatch."""
    B, in_d = x.shape
    b_pad = _round_up(B, tile_b)
    x_pad = jnp.zeros((b_pad, D_PAD), jnp.float32).at[:B, :in_d].set(x)

    grid = (b_pad // tile_b,)
    kernel = functools.partial(smallfc_fw_kernel, num_layers=num_layers,
                               compute_dtype=w_packed.dtype)

    out_pad = pl.pallas_call(
        kernel,
        out_shape=jax.ShapeDtypeStruct((b_pad, D_PAD), jnp.float32),
        grid=grid,
        in_specs=[
            # activations: one batch tile per grid step
            pl.BlockSpec((tile_b, D_PAD), lambda i: (i, 0)),
            # packed weights / biases: same block every step -> VMEM resident
            pl.BlockSpec(w_packed.shape, lambda i: (0, 0)),
            pl.BlockSpec(b_packed.shape, lambda i: (0, 0)),
        ],
        out_specs=pl.BlockSpec((tile_b, D_PAD), lambda i: (i, 0)),
        compiler_params=pltpu.CompilerParams(
            dimension_semantics=("parallel",),   # v7x: split batch tiles across 2 TCs
        ),
    )(x_pad, w_packed, b_packed)

    return out_pad[:B, :out_d]


def make_smallfc_fw(params, *, weight_dtype=jnp.float32, tile_b=None):
    """Pack params once; return a jitted forward fn: x (B,in_d) or (in_d,) -> (B,out_d)."""
    w_packed, b_packed = pack_params(params, weight_dtype)
    num_layers = len(params)
    out_d = params[-1][0].shape[1]

    def forward(x):
        x = jnp.asarray(x, jnp.float32)
        if x.ndim == 1:                       # original forward(): single obs list
            x = x[None, :]
        B = x.shape[0]
        tb = tile_b if tile_b is not None else _choose_tile_b(B)
        tb = _round_up(max(8, min(tb, _round_up(B, 8))), 8)   # multiple of 8, <= padded B
        return _smallfc_fw_jit(x, w_packed, b_packed,
                               tile_b=tb, num_layers=num_layers, out_d=out_d)

    return forward


# --------------------------- param construction ------------------------------

def init_params(key, in_d, out_d, num_hidden=3, hidden_dim=10):
    """Deterministic init mimicking torch.nn.Linear default U(-1/sqrt(fan_in), +)."""
    dims = [in_d] + [hidden_dim] * num_hidden + [out_d]
    params = []
    for i in range(len(dims) - 1):
        d_in, d_out = dims[i], dims[i + 1]
        key, kw, kb = jax.random.split(key, 3)
        bound = 1.0 / jnp.sqrt(jnp.float32(d_in))
        # stored directly as (in, out) == PyTorch Linear.weight.T
        w = jax.random.uniform(kw, (d_in, d_out), jnp.float32, -bound, bound)
        b = jax.random.uniform(kb, (1, d_out), jnp.float32, -bound, bound)
        params.append((w, b))
    return params


def reference_forward(x, params):
    """Plain-JAX reference at the original (unpadded) sizes."""
    out = x
    for (w, b) in params[:-1]:
        out = jnp.tanh(out @ w + b)
    w, b = params[-1]
    return out @ w + b


# --------------------------------- main --------------------------------------

if __name__ == "__main__":
    in_d, out_d = 16, 8
    num_hidden, hidden_dim = 3, 32
    B = 32   # stacked agent observations (original PyTorch forward is the B=1 row case)

    key = jax.random.PRNGKey(0)
    key, kx = jax.random.split(key)
    x = jax.random.normal(kx, (B, in_d), jnp.float32)
    params = init_params(key, in_d, out_d, num_hidden, hidden_dim)

    forward = make_smallfc_fw(params)        # packs params once, jitted forward

    # small batch: tile_b = 32 -> grid = (1,), single grid step
    out = forward(x)
    jax.block_until_ready(out)
    ref = reference_forward(x, params)
    assert out.shape == (B, out_d)
    assert jnp.allclose(out, ref, atol=2e-5, rtol=1e-5), "mismatch vs reference"

    # original batch=1 path (forward() with a single obs list) -> (1, out_d)
    out1 = forward(x[0])
    jax.block_until_ready(out1)
    assert out1.shape == (1, out_d)
    assert jnp.allclose(out1, ref[:1], atol=2e-5, rtol=1e-5), "batch=1 mismatch"

    # larger batch: exercises the tiled path (tile_b=256 -> grid=(2,), parallel axis)
    key, kx2 = jax.random.split(key)
    x_big = jax.random.normal(kx2, (512, in_d), jnp.float32)
    out_big = forward(x_big)
    jax.block_until_ready(out_big)
    ref_big = reference_forward(x_big, params)
    assert jnp.allclose(out_big, ref_big, atol=2e-5, rtol=1e-5), "large-batch mismatch"

    print("KERNEL_OK")
</pallas_src>

<mosaic_0001>
module attributes {stable_mosaic.version = 11 : i64} {
  func.func @smallfc_fw_kernel(%arg0: i32, %arg1: memref<32x128xf32, #tpu.memory_space<vmem>>, %arg2: memref<512x128xf32, #tpu.memory_space<vmem>>, %arg3: memref<8x128xf32, #tpu.memory_space<vmem>>, %arg4: memref<32x128xf32, #tpu.memory_space<vmem>>) attributes {dimension_semantics = [#tpu.dimension_semantics<parallel>], iteration_bounds = array<i64: 1>, scalar_prefetch = 0 : i64, scratch_operands = 0 : i64, tpu.core_type = #tpu.core_type<tc>, window_params = [{transform_indices = @transform_0, window_bounds = array<i64: 32, 128>}, {pipeline_mode = #tpu.pipeline_mode<synchronous>, transform_indices = @transform_1, window_bounds = array<i64: 512, 128>}, {pipeline_mode = #tpu.pipeline_mode<synchronous>, transform_indices = @transform_2, window_bounds = array<i64: 8, 128>}, {transform_indices = @transform_3, window_bounds = array<i64: 32, 128>}]} {
    %c0 = arith.constant 0 : index
    %c0_0 = arith.constant 0 : index
    %0 = vector.load %arg1[%c0, %c0_0] : memref<32x128xf32, #tpu.memory_space<vmem>>, vector<32x128xf32>
    %c0_1 = arith.constant 0 : index
    %c0_2 = arith.constant 0 : index
    %1 = vector.load %arg2[%c0_1, %c0_2] : memref<512x128xf32, #tpu.memory_space<vmem>>, vector<128x128xf32>
    %c0_3 = arith.constant 0 : index
    %c0_4 = arith.constant 0 : index
    %2 = vector.load %arg3[%c0_3, %c0_4] : memref<8x128xf32, #tpu.memory_space<vmem>>, vector<1x128xf32>
    %cst = arith.constant dense<0.000000e+00> : vector<32x128xf32>
    %3 = tpu.matmul %0, %1, %cst {dimension_numbers = #tpu.dot_dimension_numbers<[1], [0], [0], [1], [0, 0, 1, 1], [], []>} : vector<32x128xf32>, vector<128x128xf32>, vector<32x128xf32> -> vector<32x128xf32>
    %4 = vector.broadcast %2 : vector<1x128xf32> to vector<32x128xf32>
    %5 = arith.addf %3, %4 : vector<32x128xf32>
    %6 = math.tanh %5 : vector<32x128xf32>
    %c128 = arith.constant 128 : index
    %c0_5 = arith.constant 0 : index
    %7 = vector.load %arg2[%c128, %c0_5] : memref<512x128xf32, #tpu.memory_space<vmem>>, vector<128x128xf32>
    %c1 = arith.constant 1 : index
    %c0_6 = arith.constant 0 : index
    %8 = vector.load %arg3[%c1, %c0_6] : memref<8x128xf32, #tpu.memory_space<vmem>>, vector<1x128xf32>
    %cst_7 = arith.constant dense<0.000000e+00> : vector<32x128xf32>
    %9 = tpu.matmul %6, %7, %cst_7 {dimension_numbers = #tpu.dot_dimension_numbers<[1], [0], [0], [1], [0, 0, 1, 1], [], []>} : vector<32x128xf32>, vector<128x128xf32>, vector<32x128xf32> -> vector<32x128xf32>
    %10 = vector.broadcast %8 : vector<1x128xf32> to vector<32x128xf32>
    %11 = arith.addf %9, %10 : vector<32x128xf32>
    %12 = math.tanh %11 : vector<32x128xf32>
    %c256 = arith.constant 256 : index
    %c0_8 = arith.constant 0 : index
    %13 = vector.load %arg2[%c256, %c0_8] : memref<512x128xf32, #tpu.memory_space<vmem>>, vector<128x128xf32>
    %c2 = arith.constant 2 : index
    %c0_9 = arith.constant 0 : index
    %14 = vector.load %arg3[%c2, %c0_9] : memref<8x128xf32, #tpu.memory_space<vmem>>, vector<1x128xf32>
    %cst_10 = arith.constant dense<0.000000e+00> : vector<32x128xf32>
    %15 = tpu.matmul %12, %13, %cst_10 {dimension_numbers = #tpu.dot_dimension_numbers<[1], [0], [0], [1], [0, 0, 1, 1], [], []>} : vector<32x128xf32>, vector<128x128xf32>, vector<32x128xf32> -> vector<32x128xf32>
    %16 = vector.broadcast %14 : vector<1x128xf32> to vector<32x128xf32>
    %17 = arith.addf %15, %16 : vector<32x128xf32>
    %18 = math.tanh %17 : vector<32x128xf32>
    %c384 = arith.constant 384 : index
    %c0_11 = arith.constant 0 : index
    %19 = vector.load %arg2[%c384, %c0_11] : memref<512x128xf32, #tpu.memory_space<vmem>>, vector<128x128xf32>
    %c3 = arith.constant 3 : index
    %c0_12 = arith.constant 0 : index
    %20 = vector.load %arg3[%c3, %c0_12] : memref<8x128xf32, #tpu.memory_space<vmem>>, vector<1x128xf32>
    %cst_13 = arith.constant dense<0.000000e+00> : vector<32x128xf32>
    %21 = tpu.matmul %18, %19, %cst_13 {dimension_numbers = #tpu.dot_dimension_numbers<[1], [0], [0], [1], [0, 0, 1, 1], [], []>} : vector<32x128xf32>, vector<128x128xf32>, vector<32x128xf32> -> vector<32x128xf32>
    %22 = vector.broadcast %20 : vector<1x128xf32> to vector<32x128xf32>
    %23 = arith.addf %21, %22 : vector<32x128xf32>
    %c0_14 = arith.constant 0 : index
    %c0_15 = arith.constant 0 : index
    %24 = vector.load %arg4[%c0_14, %c0_15] : memref<32x128xf32, #tpu.memory_space<vmem>>, vector<32x128xf32>
    tpu.vector_store %arg4[%c0_14, %c0_15], %23 {strides = array<i32>} : memref<32x128xf32, #tpu.memory_space<vmem>>, vector<32x128xf32>,
    return
  }
  func.func @transform_0(%arg0: i32) -> (i32, i32) {
    %c0_i32 = arith.constant 0 : i32
    %c0_i32_0 = arith.constant 0 : i32
    return %arg0, %c0_i32 : i32, i32
  }
  func.func @transform_1(%arg0: i32) -> (i32, i32) {
    %c0_i32 = arith.constant 0 : i32
    %c0_i32_0 = arith.constant 0 : i32
    %c0_i32_1 = arith.constant 0 : i32
    return %c0_i32, %c0_i32_0 : i32, i32
  }
  func.func @transform_2(%arg0: i32) -> (i32, i32) {
    %c0_i32 = arith.constant 0 : i32
    %c0_i32_0 = arith.constant 0 : i32
    %c0_i32_1 = arith.constant 0 : i32
    return %c0_i32, %c0_i32_0 : i32, i32
  }
  func.func @transform_3(%arg0: i32) -> (i32, i32) {
    %c0_i32 = arith.constant 0 : i32
    %c0_i32_0 = arith.constant 0 : i32
    return %arg0, %c0_i32 : i32, i32
  }
}

</mosaic_0001>

<bundles_post_ra>
// kernel: _smallfc_fw_jit.1
= control target key start
LH: loop header
LB: loop body
LE: loop exit
PB: predicated region body
PF: predicated region fallthrough
CT: control target
= control target key end

     0   :  { %8 = vsyncpa [#allocation3], 0  ;;  %s892_s12 = smov [#allocation2]   ;;  %s963_s0 = inlined_call_operand.vmem [shape: f32[32,128], index: 0, kind: input, shape index: {}]   ;;  %s964_s1 = inlined_call_operand.hbm [shape: f32[512,128], index: 1, kind: input, shape index: {}]   ;;  %s965_s2 = inlined_call_operand.vmem [shape: f32[8,128], index: 2, kind: input, shape index: {}]   ;;  %s966_s3 = inlined_call_operand.vmem [shape: f32[32,128], index: 3, kind: output, shape index: {}]  }
   0x1   :  { %s16_s13 = sshll.u32 %s892_s12, 4  ;;  %s868_s16 = scalar_lea.hbm %s964_s1, 8192  ;;  %s17_s13 = int_to_ptr.vmem [resolvable:$true] %s16_s13 }
   0x2   :  { %p869_p0 = scmp.ne.s32.totalorder %s964_s1, %s868_s16  ;;  %p872_p1 = scmp.lt.u32.totalorder %s868_s16, %s964_s1 }
   0x4   :  { %p874_p2 = pnand %p872_p1, %p869_p0 }
   0x6   :  { %877 = shalt.err (!%p874_p2)
}
   0x7   :  { %s878_s21 = scalar_lea.vmem %s17_s13, 8192  ;;  %p883_p4 = scmp.lt.s32.totalorder %s17_s13, %s17_s13 }
   0x8   :  { %p879_p3 = scmp.ne.s32.totalorder %s17_s13, %s878_s21  ;;  %p884_p5 = scmp.lt.s32.totalorder %s878_s21, %s878_s21 }
   0xa   :  { %p885_p6 = por %p884_p5, %p883_p4 }
   0xc   :  { %p886_p7 = pnand %p885_p6, %p879_p3 }
   0xe   :  { %889 = shalt.err (!%p886_p7)
}
   0xf   :  { %s893_s22 = smov 128   ;;  %s894_s23 = smov 8  }
  0x10   :  { %22 = dma.hbm_to_vmem [thread:$0]  %s964_s1, 8192, %s17_s13, [#allocation3], %s893_s22, %s893_s22, %s894_s23  }
  0x11   :  { %890 = dma.done.wait [#allocation3], 8192  }
  0x12   :  { %891 = vsyncadd [#allocation3], 4294959104  ;;  %v32_v0 = vld [vmem:[#allocation2] sm:$0xff]  ;;  %v33_v1 = vld [vmem:[#allocation2 + $0x8] sm:$0xff] }
  0x13   :  { %v34_v2 = vld [vmem:[#allocation2 + $0x10] sm:$0xff]  ;;  %v713_v3 = vpack.c.bf16 %v33_v1, %v32_v0  ;;  %v35_v4 = vld [vmem:[#allocation2 + $0x18] sm:$0xff]  ;;  %v36_v6 = vld [vmem:[#allocation2 + $0x20] sm:$0xff] }
  0x14   :  { %v717_v5 = vpack.c.bf16 %v35_v4, %v34_v2  ;;  %v37_v7 = vld [vmem:[#allocation2 + $0x28] sm:$0xff]  ;;  %v28_v9 = vld [vmem:[%s963_s0] sm:$0xff]  ;;  %v38_v10 = vld [vmem:[#allocation2 + $0x30] sm:$0xff] }
  0x15   :  { %714 = vmatprep.subr.bf16.mxu0 %v713_v3  ;;  %v721_v8 = vpack.c.bf16 %v37_v7, %v36_v6  ;;  %v39_v11 = vld [vmem:[#allocation2 + $0x38] sm:$0xff]  ;;  %593 = vmatprep.mubr.f32.mxu0 %v28_v9  ;;  %v142_v12 = vld [vmem:[#allocation2 + $0x80] sm:$0xff]  ;;  %v143_v13 = vld [vmem:[#allocation2 + $0x88] sm:$0xff] }
  0x16   :  { %716 = vmatpush3.bf16.msra.mxu0 %v713_v3  ;;  %v144_v14 = vld [vmem:[#allocation2 + $0x90] sm:$0xff]  ;;  %v145_v15 = vld [vmem:[#allocation2 + $0x98] sm:$0xff]  ;;  %v745_v16 = vpack.c.bf16 %v143_v13, %v142_v12  ;;  %v725_v18 = vpack.c.bf16 %v39_v11, %v38_v10  ;;  %v146_v19 = vld [vmem:[#allocation2 + $0xa0] sm:$0xff] }
  0x17   :  { %718 = vmatprep.subr.bf16.mxu0 %v717_v5  ;;  %v749_v17 = vpack.c.bf16 %v145_v15, %v144_v14  ;;  %v147_v20 = vld [vmem:[#allocation2 + $0xa8] sm:$0xff]  ;;  %v40_v21 = vld [vmem:[#allocation2 + $0x40] sm:$0xff]  ;;  %v148_v25 = vld [vmem:[#allocation2 + $0xb0] sm:$0xff] }
  0x18   :  { %v41_v22 = vld [vmem:[#allocation2 + $0x48] sm:$0xff]  ;;  %746 = vmatprep.subr.bf16.mxu1 %v745_v16  ;;  %v753_v23 = vpack.c.bf16 %v147_v20, %v146_v19  ;;  %v149_v26 = vld [vmem:[#allocation2 + $0xb8] sm:$0xff]  ;;  %v42_v27 = vld [vmem:[#allocation2 + $0x50] sm:$0xff] }
  0x19   :  { %748 = vmatpush3.bf16.msra.mxu1 %v745_v16  ;;  %v729_v24 = vpack.c.bf16 %v41_v22, %v40_v21  ;;  %v43_v28 = vld [vmem:[#allocation2 + $0x58] sm:$0xff]  ;;  %v757_v29 = vpack.c.bf16 %v149_v26, %v148_v25  ;;  %v44_v31 = vld [vmem:[#allocation2 + $0x60] sm:$0xff]  ;;  %v45_v32 = vld [vmem:[#allocation2 + $0x68] sm:$0xff] }
  0x1a   :  { %720 = vmatpush3.bf16.msra.mxu0 %v717_v5  ;;  %750 = vmatprep.subr.bf16.mxu1 %v749_v17  ;;  %v733_v30 = vpack.c.bf16 %v43_v28, %v42_v27  ;;  %v737_v33 = vpack.c.bf16 %v45_v32, %v44_v31  ;;  %v46_v34 = vld [vmem:[#allocation2 + $0x70] sm:$0xff]  ;;  %v47_v35 = vld [vmem:[#allocation2 + $0x78] sm:$0xff]  ;;  %v29_v37 = vld [vmem:[%s963_s0 + $0x8] sm:$0xff] }
  0x1b   :  { %722 = vmatprep.subr.bf16.mxu0 %v721_v8  ;;  %v741_v36 = vpack.c.bf16 %v47_v35, %v46_v34  ;;  %v30_v38 = vld [vmem:[%s963_s0 + $0x10] sm:$0xff]  ;;  %v31_v39 = vld [vmem:[%s963_s0 + $0x18] sm:$0xff]  ;;  %v150_v40 = vld [vmem:[#allocation2 + $0xc0] sm:$0xff] }
  0x1c   :  { %v151_v41 = vld [vmem:[#allocation2 + $0xc8] sm:$0xff]  ;;  %v152_v43 = vld [vmem:[#allocation2 + $0xd0] sm:$0xff]  ;;  %v153_v44 = vld [vmem:[#allocation2 + $0xd8] sm:$0xff] }
  0x1d   :  { %752 = vmatpush3.bf16.msra.mxu1 %v749_v17  ;;  %v761_v42 = vpack.c.bf16 %v151_v41, %v150_v40  ;;  %v765_v45 = vpack.c.bf16 %v153_v44, %v152_v43  ;;  %v154_v46 = vld [vmem:[#allocation2 + $0xe0] sm:$0xff]  ;;  %v155_v47 = vld [vmem:[#allocation2 + $0xe8] sm:$0xff]  ;;  %v156_v49 = vld [vmem:[#allocation2 + $0xf0] sm:$0xff] }
  0x1e   :  { %724 = vmatpush3.bf16.msra.mxu0 %v721_v8  ;;  %754 = vmatprep.subr.bf16.mxu1 %v753_v23  ;;  %v769_v48 = vpack.c.bf16 %v155_v47, %v154_v46  ;;  %v157_v50 = vld [vmem:[#allocation2 + $0xf8] sm:$0xff]  ;;  %v252_v52 = vld [vmem:[#allocation2 + $0x100] sm:$0xff]  ;;  %v253_v53 = vld [vmem:[#allocation2 + $0x108] sm:$0xff] }
  0x1f   :  { %726 = vmatprep.subr.bf16.mxu0 %v725_v18  ;;  %v773_v51 = vpack.c.bf16 %v157_v50, %v156_v49  ;;  %v254_v54 = vld [vmem:[#allocation2 + $0x110] sm:$0xff]  ;;  %v777_v55 = vpack.c.bf16 %v253_v53, %v252_v52  ;;  %v255_v56 = vld [vmem:[#allocation2 + $0x118] sm:$0xff]  ;;  %v256_v58 = vld [vmem:[#allocation2 + $0x120] sm:$0xff] }
  0x20   :  { %v781_v57 = vpack.c.bf16 %v255_v56, %v254_v54  ;;  %v257_v59 = vld [vmem:[#allocation2 + $0x128] sm:$0xff]  ;;  %v258_v61 = vld [vmem:[#allocation2 + $0x130] sm:$0xff]  ;;  %v259_v62 = vld [vmem:[#allocation2 + $0x138] sm:$0xff] }
  0x21   :  { %756 = vmatpush3.bf16.msra.mxu1 %v753_v23  ;;  %v785_v60 = vpack.c.bf16 %v257_v59, %v256_v58  ;;  %v789_v63 = vpack.c.bf16 %v259_v62, %v258_v61  ;;  %v477_v0 = vld [vmem:[%s965_s2] ss:$0 sm:$0xff]  ;;  %v261_v14 = vld [vmem:[#allocation2 + $0x148] sm:$0xff]  ;;  %v262_v16 = vld [vmem:[#allocation2 + $0x150] sm:$0xff] }
  0x22   :  { %728 = vmatpush3.bf16.msra.mxu0 %v725_v18  ;;  %758 = vmatprep.subr.bf16.mxu1 %v757_v29  ;;  %v260_v13 = vld [vmem:[#allocation2 + $0x140] sm:$0xff]  ;;  %v263_v17 = vld [vmem:[#allocation2 + $0x158] sm:$0xff]  ;;  %v265_v20 = vld [vmem:[#allocation2 + $0x168] sm:$0xff] }
  0x23   :  { %730 = vmatprep.subr.bf16.mxu0 %v729_v24  ;;  %v793_v15 = vpack.c.bf16 %v261_v14, %v260_v13  ;;  %v797_v18 = vpack.c.bf16 %v263_v17, %v262_v16  ;;  %v264_v19 = vld [vmem:[#allocation2 + $0x160] sm:$0xff]  ;;  %v266_v22 = vld [vmem:[#allocation2 + $0x170] sm:$0xff]  ;;  %v267_v23 = vld [vmem:[#allocation2 + $0x178] sm:$0xff] }
  0x24   :  { %v801_v21 = vpack.c.bf16 %v265_v20, %v264_v19  ;;  %v362_v25 = vld [vmem:[#allocation2 + $0x180] sm:$0xff]  ;;  %v363_v26 = vld [vmem:[#allocation2 + $0x188] sm:$0xff]  ;;  %v364_v27 = vld [vmem:[#allocation2 + $0x190] sm:$0xff] }
  0x25   :  { %760 = vmatpush3.bf16.msra.mxu1 %v757_v29  ;;  %v809_v28 = vpack.c.bf16 %v363_v26, %v362_v25  ;;  %v365_v29 = vld [vmem:[#allocation2 + $0x198] sm:$0xff]  ;;  %v366_v31 = vld [vmem:[#allocation2 + $0x1a0] sm:$0xff]  ;;  %v367_v32 = vld [vmem:[#allocation2 + $0x1a8] sm:$0xff] }
  0x26   :  { %732 = vmatpush3.bf16.msra.mxu0 %v729_v24  ;;  %762 = vmatprep.subr.bf16.mxu1 %v761_v42  ;;  %v805_v24 = vpack.c.bf16 %v267_v23, %v266_v22  ;;  %v368_v34 = vld [vmem:[#allocation2 + $0x1b0] sm:$0xff]  ;;  %v369_v35 = vld [vmem:[#allocation2 + $0x1b8] sm:$0xff]  ;;  %v370_v50 = vld [vmem:[#allocation2 + $0x1c0] sm:$0xff] }
  0x27   :  { %734 = vmatprep.subr.bf16.mxu0 %v733_v30  ;;  %v372_v53 = vld [vmem:[#allocation2 + $0x1d0] sm:$0xff]  ;;  %v373_v54 = vld [vmem:[#allocation2 + $0x1d8] sm:$0xff]  ;;  %v374_v56 = vld [vmem:[#allocation2 + $0x1e0] sm:$0xff] }
  0x28   :  { %v376_v59 = vld [vmem:[#allocation2 + $0x1f0] sm:$0xff]  ;;  %v479_v62 = vld [vmem:[%s965_s2 + $0x2] ss:$0 sm:$0xff] }
  0x29   :  { %764 = vmatpush3.bf16.msra.mxu1 %v761_v42 }
  0x2a   :  { %736 = vmatpush3.bf16.msra.mxu0 %v733_v30  ;;  %766 = vmatprep.subr.bf16.mxu1 %v765_v45  ;;  %v813_v30 = vpack.c.bf16 %v365_v29, %v364_v27 }
  0x2b   :  { %738 = vmatprep.subr.bf16.mxu0 %v737_v33 }
  0x2d   :  { %768 = vmatpush3.bf16.msra.mxu1 %v765_v45 }
  0x2e   :  { %740 = vmatpush3.bf16.msra.mxu0 %v737_v33  ;;  %770 = vmatprep.subr.bf16.mxu1 %v769_v48  ;;  %v817_v33 = vpack.c.bf16 %v367_v32, %v366_v31 }
  0x2f   :  { %742 = vmatprep.subr.bf16.mxu0 %v741_v36 }
  0x31   :  { %772 = vmatpush3.bf16.msra.mxu1 %v769_v48 }
  0x32   :  { %744 = vmatpush3.bf16.msra.mxu0 %v741_v36  ;;  %774 = vmatprep.subr.bf16.mxu1 %v773_v51  ;;  %v821_v36 = vpack.c.bf16 %v369_v35, %v368_v34 }
  0x33   :  { %778 = vmatprep.subr.bf16.mxu0 %v777_v55 }
  0x35   :  { %594 = vmatmul.mubr.f32.vlgmr.msra.gmra.mrb[0].mxu0 %v29_v37  ;;  %776 = vmatpush3.bf16.msra.mxu1 %v773_v51  ;;  %v478_v37 = vld [vmem:[%s965_s2 + $0x1] ss:$0 sm:$0xff]  ;;  %v371_v51 = vld [vmem:[#allocation2 + $0x1c8] sm:$0xff] }
  0x36   :  { %596 = vmatprep.mubr.f32.mxu0 %v30_v38  ;;  %780 = vmatpush3.bf16.msra.mxu0 %v777_v55  ;;  %v825_v52 = vpack.c.bf16 %v371_v51, %v370_v50  ;;  %v829_v55 = vpack.c.bf16 %v373_v54, %v372_v53 }
  0x37   :  { %782 = vmatprep.subr.bf16.mxu0 %v781_v57  ;;  %810 = vmatprep.subr.bf16.mxu1 %v809_v28 }
  0x39   :  { %597 = vmatmul.mubr.f32.gmra.mrb[2].mxu0 %v31_v39 }
  0x3a   :  { %784 = vmatpush3.bf16.msra.mxu0 %v781_v57  ;;  %v375_v57 = vld [vmem:[#allocation2 + $0x1e8] sm:$0xff] }
  0x3b   :  { %786 = vmatprep.subr.bf16.mxu0 %v785_v60  ;;  %v833_v58 = vpack.c.bf16 %v375_v57, %v374_v56 }
  0x3e   :  { %788 = vmatpush3.bf16.msra.mxu0 %v785_v60  ;;  %v377_v60 = vld [vmem:[#allocation2 + $0x1f8] sm:$0xff] }
  0x3f   :  { %790 = vmatprep.subr.bf16.mxu0 %v789_v63  ;;  %v837_v61 = vpack.c.bf16 %v377_v60, %v376_v59 }
  0x42   :  { %792 = vmatpush3.bf16.msra.mxu0 %v789_v63 }
  0x43   :  { %794 = vmatprep.subr.bf16.mxu0 %v793_v15 }
  0x46   :  { %796 = vmatpush3.bf16.msra.mxu0 %v793_v15 }
  0x47   :  { %798 = vmatprep.subr.bf16.mxu0 %v797_v18 }
  0x4a   :  { %800 = vmatpush3.bf16.msra.mxu0 %v797_v18 }
  0x4b   :  { %802 = vmatprep.subr.bf16.mxu0 %v801_v21 }
  0x4e   :  { %804 = vmatpush3.bf16.msra.mxu0 %v801_v21 }
  0x4f   :  { %806 = vmatprep.subr.bf16.mxu0 %v805_v24 }
  0x52   :  { %808 = vmatpush3.bf16.msra.mxu0 %v805_v24 }
 0x108   :  { %v595_v1 = vpop.f32.mrb[0].mxu0 }
 0x109   :  { %v125_v2 = vadd.f32 %v595_v1, %v477_v0  ;;  %v119_v3 = vpop.f32.mrb[1].mxu0 }
 0x10a   :  { %v120_v4 = vadd.f32 %v477_v0, %v119_v3 }
 0x10c   :  { %844 = vtanh.f32 %v120_v4  ;;  %v598_v5 = vpop.f32.mrb[2].mxu0 }
 0x10d   :  { %846 = vtanh.f32 %v125_v2  ;;  %v135_v6 = vadd.f32 %v598_v5, %v477_v0  ;;  %v129_v7 = vpop.f32.mrb[3].mxu0 }
 0x10e   :  { %v130_v8 = vadd.f32 %v477_v0, %v129_v7 }
 0x110   :  { %848 = vtanh.f32 %v130_v8 }
 0x111   :  { %850 = vtanh.f32 %v135_v6 }
 0x116   :  { %v845_v9 = vpop.eup %844 }
 0x117   :  { %v847_v10 = vpop.eup %846  ;;  %631 = vmatprep.mubr.f32.mxu1 %v845_v9 }
 0x118   :  { %632 = vmatmul.mubr.f32.vlgmr.msra.gmra.mrb[0].mxu1 %v847_v10 }
 0x119   :  { %812 = vmatpush3.bf16.msra.mxu1 %v809_v28 }
 0x11a   :  { %v849_v11 = vpop.eup %848  ;;  %814 = vmatprep.subr.bf16.mxu1 %v813_v30 }
 0x11b   :  { %v851_v12 = vpop.eup %850  ;;  %634 = vmatprep.mubr.f32.mxu1 %v849_v11  ;;  %v480_v11 = vld [vmem:[%s965_s2 + $0x3] ss:$0 sm:$0xff] }
 0x11c   :  { %635 = vmatmul.mubr.f32.gmra.mrb[2].mxu1 %v851_v12 }
 0x11d   :  { %816 = vmatpush3.bf16.msra.mxu1 %v813_v30 }
 0x11e   :  { %818 = vmatprep.subr.bf16.mxu1 %v817_v33 }
 0x121   :  { %820 = vmatpush3.bf16.msra.mxu1 %v817_v33 }
 0x122   :  { %822 = vmatprep.subr.bf16.mxu1 %v821_v36 }
 0x125   :  { %824 = vmatpush3.bf16.msra.mxu1 %v821_v36 }
 0x126   :  { %826 = vmatprep.subr.bf16.mxu1 %v825_v52 }
 0x129   :  { %828 = vmatpush3.bf16.msra.mxu1 %v825_v52 }
 0x12a   :  { %830 = vmatprep.subr.bf16.mxu1 %v829_v55 }
 0x12d   :  { %832 = vmatpush3.bf16.msra.mxu1 %v829_v55 }
 0x12e   :  { %834 = vmatprep.subr.bf16.mxu1 %v833_v58 }
 0x131   :  { %836 = vmatpush3.bf16.msra.mxu1 %v833_v58 }
 0x132   :  { %838 = vmatprep.subr.bf16.mxu1 %v837_v61 }
 0x135   :  { %840 = vmatpush3.bf16.msra.mxu1 %v837_v61 }
 0x1eb   :  { %v633_v38 = vpop.f32.mrb[0].mxu1 }
 0x1ec   :  { %v235_v39 = vadd.f32 %v633_v38, %v478_v37  ;;  %v229_v40 = vpop.f32.mrb[1].mxu1 }
 0x1ed   :  { %v230_v41 = vadd.f32 %v478_v37, %v229_v40 }
 0x1ef   :  { %852 = vtanh.f32 %v230_v41  ;;  %v636_v42 = vpop.f32.mrb[2].mxu1 }
 0x1f0   :  { %854 = vtanh.f32 %v235_v39  ;;  %v245_v43 = vadd.f32 %v636_v42, %v478_v37  ;;  %v239_v44 = vpop.f32.mrb[3].mxu1 }
 0x1f1   :  { %v240_v45 = vadd.f32 %v478_v37, %v239_v44 }
 0x1f3   :  { %856 = vtanh.f32 %v240_v45 }
 0x1f4   :  { %858 = vtanh.f32 %v245_v43 }
 0x1f9   :  { %v853_v46 = vpop.eup %852 }
 0x1fa   :  { %v855_v47 = vpop.eup %854  ;;  %669 = vmatprep.mubr.f32.mxu0 %v853_v46 }
 0x1fb   :  { %670 = vmatmul.mubr.f32.vlgmr.msra.gmra.mrb[4].mxu0 %v855_v47 }
 0x1fd   :  { %v857_v48 = vpop.eup %856 }
 0x1fe   :  { %v859_v49 = vpop.eup %858  ;;  %672 = vmatprep.mubr.f32.mxu0 %v857_v48 }
 0x1ff   :  { %673 = vmatmul.mubr.f32.gmra.mrb[6].mxu0 %v859_v49 }
 0x2ce   :  { %v671_v63 = vpop.f32.mrb[4].mxu0 }
 0x2cf   :  { %v345_v0 = vadd.f32 %v671_v63, %v479_v62  ;;  %v339_v1 = vpop.f32.mrb[5].mxu0 }
 0x2d0   :  { %v340_v2 = vadd.f32 %v479_v62, %v339_v1 }
 0x2d2   :  { %860 = vtanh.f32 %v340_v2  ;;  %v674_v3 = vpop.f32.mrb[6].mxu0 }
 0x2d3   :  { %862 = vtanh.f32 %v345_v0  ;;  %v355_v4 = vadd.f32 %v674_v3, %v479_v62  ;;  %v349_v5 = vpop.f32.mrb[7].mxu0 }
 0x2d4   :  { %v350_v6 = vadd.f32 %v479_v62, %v349_v5 }
 0x2d6   :  { %864 = vtanh.f32 %v350_v6 }
 0x2d7   :  { %866 = vtanh.f32 %v355_v4 }
 0x2dc   :  { %v861_v7 = vpop.eup %860 }
 0x2dd   :  { %v863_v8 = vpop.eup %862  ;;  %707 = vmatprep.mubr.f32.mxu1 %v861_v7 }
 0x2de   :  { %708 = vmatmul.mubr.f32.vlgmr.msra.gmra.mrb[4].mxu1 %v863_v8 }
 0x2e0   :  { %v865_v9 = vpop.eup %864 }
 0x2e1   :  { %v867_v10 = vpop.eup %866  ;;  %710 = vmatprep.mubr.f32.mxu1 %v865_v9 }
 0x2e2   :  { %711 = vmatmul.mubr.f32.gmra.mrb[6].mxu1 %v867_v10 }
 0x3b1   :  { %v709_v12 = vpop.f32.mrb[4].mxu1 }
 0x3b2   :  { %v455_v13 = vadd.f32 %v709_v12, %v480_v11  ;;  %v449_v14 = vpop.f32.mrb[5].mxu1 }
 0x3b3   :  { %v450_v15 = vadd.f32 %v480_v11, %v449_v14 }
 0x3b4   :  { %469 = vst [vmem:[%s966_s3 + $0x8] sm:$0xff] %v455_v13 }
 0x3b5   :  { %468 = vst [vmem:[%s966_s3] sm:$0xff] %v450_v15  ;;  %v712_v16 = vpop.f32.mrb[6].mxu1 }
 0x3b6   :  { %v465_v17 = vadd.f32 %v712_v16, %v480_v11  ;;  %v459_v18 = vpop.f32.mrb[7].mxu1 }
 0x3b7   :  { %v460_v19 = vadd.f32 %v480_v11, %v459_v18 }
 0x3b8   :  { %471 = vst [vmem:[%s966_s3 + $0x18] sm:$0xff] %v465_v17 }
 0x3b9   :  { %470 = vst [vmem:[%s966_s3 + $0x10] sm:$0xff] %v460_v19 }
 0x3ba   :  { %476 = vsyncpa [#allocation3], 1 }

</bundles_post_ra>
